<compile_context>
chip_gen: v5e
topology: v5e:2x2
jax: 0.10.0
libtpu: 0.0.40
codegen_flags: <defaults>
</compile_context>

<pallas_src>
import functools

import jax
import jax.numpy as jnp
from jax.experimental import pallas as pl
from jax.experimental.pallas import tpu as pltpu

_SUBLANE = 8
_LANE = 128
_TILE_ELEMS = 512 * 512          # ~1 MiB of f32 per input tile


def _cdiv(a, b):
    return -(-a // b)


def _choose_layout(n):
    """Pick a lane-dense 2-D layout + row tiling for a flat array of n elements."""
    cols = None
    for cand in (4 * _LANE, 2 * _LANE, _LANE):       # widest first
        if n % cand == 0 and (n // cand) % _SUBLANE == 0:
            cols = cand                              # free reshape, no padding copy
            break
    if cols is None:
        cols = _LANE                                 # awkward size: pad + mask
    rows = _cdiv(n, cols)
    rows_padded = _cdiv(rows, _SUBLANE) * _SUBLANE
    tile_rows = min(rows_padded, _TILE_ELEMS // cols)
    n_tiles = _cdiv(rows_padded, tile_rows)
    # Two independent partial sums on a leading "parallel" grid axis lets
    # multi-TensorCore chips (v7x) split the stream across cores.  Only when the
    # tile count splits evenly (avoids fully out-of-bounds tiles).
    parts = 2 if (n_tiles >= 2 and n_tiles % 2 == 0) else 1
    tiles_per_part = n_tiles // parts
    return cols, rows_padded, tile_rows, parts, tiles_per_part


def _streaming_sq_kernel(a_ref, b_ref, out_ref, acc_ref, *, margin, hinge,
                         n_valid, needs_mask, tile_rows, cols, tiles_per_part):
    c = pl.program_id(0)          # partial-sum index ("parallel")
    i = pl.program_id(1)          # tile index within the partial ("arbitrary")

    @pl.when(i == 0)
    def _init():
        acc_ref[...] = jnp.zeros_like(acc_ref)

    # Cast AFTER the tile lands in VMEM: HBM traffic stays at the storage dtype.
    d = a_ref[...].astype(jnp.float32) - b_ref[...].astype(jnp.float32)
    sq = d * d
    if hinge:
        h = jnp.maximum(jnp.float32(margin) - sq, 0.0)   # relu(margin - diff^2)
        term = h * h
    else:
        term = sq

    if needs_mask:
        # Zero out padded / out-of-bounds elements (row-major linear index).
        row = jax.lax.broadcasted_iota(jnp.int32, (tile_rows, cols), 0)
        col = jax.lax.broadcasted_iota(jnp.int32, (tile_rows, cols), 1)
        row0 = (c * tiles_per_part + i) * tile_rows
        lin = (row0 + row) * cols + col
        term = jnp.where(lin < n_valid, term, 0.0)

    # Pure-VPU elementwise accumulation in the steady state (co-issues under DMA).
    acc_ref[...] += term

    @pl.when(i == pl.num_programs(1) - 1)
    def _finalize():
        # Single vreg-add tree; output stays lane-dense (8, cols).
        out_ref[...] = acc_ref[...].reshape(
            tile_rows // _SUBLANE, _SUBLANE, cols).sum(axis=0)


def _sum_of_terms(a, b, *, margin, hinge):
    """Sum over all elements of (a-b)^2 (hinge=False) or relu(margin-(a-b)^2)^2."""
    n = a.size
    cols, rows_padded, tile_rows, parts, tiles_per_part = _choose_layout(n)

    a_flat = a.reshape(-1)
    b_flat = b.reshape(-1)
    n_2d = rows_padded * cols
    if n_2d != n:                       # only for awkward sizes; masked in-kernel
        a_flat = jnp.pad(a_flat, (0, n_2d - n))
        b_flat = jnp.pad(b_flat, (0, n_2d - n))
    a2 = a_flat.reshape(rows_padded, cols)
    b2 = b_flat.reshape(rows_padded, cols)

    covered = parts * tiles_per_part * tile_rows * cols
    needs_mask = bool(covered != n)

    kernel = functools.partial(
        _streaming_sq_kernel,
        margin=float(margin),
        hinge=hinge,
        n_valid=int(n),
        needs_mask=needs_mask,
        tile_rows=tile_rows,
        cols=cols,
        tiles_per_part=tiles_per_part,
    )

    def in_map(c, i):
        return (c * tiles_per_part + i, 0)

    partials = pl.pallas_call(
        kernel,
        out_shape=jax.ShapeDtypeStruct((parts * _SUBLANE, cols), jnp.float32),
        grid=(parts, tiles_per_part),
        in_specs=[pl.BlockSpec((tile_rows, cols), in_map),
                  pl.BlockSpec((tile_rows, cols), in_map)],
        out_specs=pl.BlockSpec((_SUBLANE, cols), lambda c, i: (c, 0)),
        scratch_shapes=[pltpu.VMEM((tile_rows, cols), jnp.float32)],
        compiler_params=pltpu.CompilerParams(
            dimension_semantics=("parallel", "arbitrary"),
            vmem_limit_bytes=32 * 1024 * 1024,
        ),
    )(a2, b2)
    # Tiny lane-dense (parts*8, cols) partial block; final reduce in the wrapper.
    return jnp.sum(partials)


@functools.partial(jax.jit, static_argnames=("margin",))
def contrastive_loss(pos_a, pos_b, neg_a, neg_b, *, margin=1.0):
    """Pallas TPU implementation of ContrastiveLoss.forward((pos_a,pos_b),(neg_a,neg_b))."""
    pos_sum = _sum_of_terms(pos_a, pos_b, margin=margin, hinge=False)
    neg_sum = _sum_of_terms(neg_a, neg_b, margin=margin, hinge=True)
    return pos_sum / pos_a.size + neg_sum / neg_a.size


def _reference(pos_a, pos_b, neg_a, neg_b, margin):
    pa, pb = pos_a.astype(jnp.float32), pos_b.astype(jnp.float32)
    na, nb = neg_a.astype(jnp.float32), neg_b.astype(jnp.float32)
    pos_loss = jnp.mean((pa - pb) ** 2)
    neg_loss = jnp.mean(jnp.maximum(margin - (na - nb) ** 2, 0.0) ** 2)
    return pos_loss + neg_loss


if __name__ == "__main__":
    # ContrastiveLoss has no learnable parameters; only margin.
    key = jax.random.PRNGKey(0)
    k1, k2, k3, k4 = jax.random.split(key, 4)

    # Primary small demo: (batch, hidden) embedding pairs.
    batch, hidden = 8, 128
    pos_a = jax.random.normal(k1, (batch, hidden), dtype=jnp.float32)
    pos_b = pos_a + 0.1 * jax.random.normal(k2, (batch, hidden), dtype=jnp.float32)
    neg_a = jax.random.normal(k3, (batch, hidden), dtype=jnp.float32)
    neg_b = jax.random.normal(k4, (batch, hidden), dtype=jnp.float32)

    loss = jax.block_until_ready(contrastive_loss(pos_a, pos_b, neg_a, neg_b, margin=1.0))
    ref = _reference(pos_a, pos_b, neg_a, neg_b, 1.0)
    assert jnp.allclose(loss, ref, rtol=1e-5, atol=1e-5), (loss, ref)

    # Different pos/neg shapes + non-lane-aligned sizes (exercises pad + mask path).
    ka, kb, kc, kd = jax.random.split(jax.random.PRNGKey(1), 4)
    p_a = jax.random.normal(ka, (100, 96), dtype=jnp.float32)
    p_b = jax.random.normal(kb, (100, 96), dtype=jnp.float32)
    n_a = jax.random.normal(kc, (60, 96), dtype=jnp.float32)
    n_b = jax.random.normal(kd, (60, 96), dtype=jnp.float32)
    loss2 = jax.block_until_ready(contrastive_loss(p_a, p_b, n_a, n_b, margin=0.5))
    ref2 = _reference(p_a, p_b, n_a, n_b, 0.5)
    assert jnp.allclose(loss2, ref2, rtol=1e-5, atol=1e-5), (loss2, ref2)

    # bf16 storage + multi-tile grid + 2 partial sums (exercises the in-kernel
    # cast, pipelined accumulation, boundary masking and the "parallel" axis).
    ke, kf, kg, kh = jax.random.split(jax.random.PRNGKey(2), 4)
    bp_a = jax.random.normal(ke, (1664, 512), dtype=jnp.bfloat16)
    bp_b = jax.random.normal(kf, (1664, 512), dtype=jnp.bfloat16)
    bn_a = jax.random.normal(kg, (1664, 512), dtype=jnp.bfloat16)
    bn_b = jax.random.normal(kh, (1664, 512), dtype=jnp.bfloat16)
    loss3 = jax.block_until_ready(contrastive_loss(bp_a, bp_b, bn_a, bn_b, margin=1.0))
    ref3 = _reference(bp_a, bp_b, bn_a, bn_b, 1.0)
    assert jnp.allclose(loss3, ref3, rtol=1e-3, atol=1e-3), (loss3, ref3)

    print("KERNEL_OK")
</pallas_src>

<mosaic_0001>
module attributes {stable_mosaic.version = 11 : i64} {
  func.func @_streaming_sq_kernel(%arg0: i32, %arg1: i32, %arg2: memref<8x128xf32, #tpu.memory_space<vmem>>, %arg3: memref<8x128xf32, #tpu.memory_space<vmem>>, %arg4: memref<8x128xf32, #tpu.memory_space<vmem>>, %arg5: memref<8x128xf32, #tpu.memory_space<vmem>>) attributes {dimension_semantics = [#tpu.dimension_semantics<parallel>, #tpu.dimension_semantics<arbitrary>], iteration_bounds = array<i64: 1, 1>, scalar_prefetch = 0 : i64, scratch_operands = 1 : i64, tpu.core_type = #tpu.core_type<tc>, window_params = [{transform_indices = @transform_0, window_bounds = array<i64: 8, 128>}, {transform_indices = @transform_1, window_bounds = array<i64: 8, 128>}, {transform_indices = @transform_2, window_bounds = array<i64: 8, 128>}]} {
    %c0_i32 = arith.constant 0 : i32
    %0 = arith.cmpi eq, %arg1, %c0_i32 : i32
    %1 = arith.extui %0 : i1 to i32
    %c0_i32_0 = arith.constant 0 : i32
    %2 = arith.cmpi ne, %1, %c0_i32_0 : i32
    scf.if %2 {
      %cst_11 = arith.constant 0.000000e+00 : f32
      %18 = vector.broadcast %cst_11 : f32 to vector<8x128xf32>
      %c0_12 = arith.constant 0 : index
      %c0_13 = arith.constant 0 : index
      %19 = vector.load %arg5[%c0_12, %c0_13] : memref<8x128xf32, #tpu.memory_space<vmem>>, vector<8x128xf32>
      tpu.vector_store %arg5[%c0_12, %c0_13], %18 {strides = array<i32>} : memref<8x128xf32, #tpu.memory_space<vmem>>, vector<8x128xf32>,
    } else {
    }
    %c0 = arith.constant 0 : index
    %c0_1 = arith.constant 0 : index
    %3 = vector.load %arg2[%c0, %c0_1] : memref<8x128xf32, #tpu.memory_space<vmem>>, vector<8x128xf32>
    %c0_2 = arith.constant 0 : index
    %c0_3 = arith.constant 0 : index
    %4 = vector.load %arg3[%c0_2, %c0_3] : memref<8x128xf32, #tpu.memory_space<vmem>>, vector<8x128xf32>
    %5 = arith.subf %3, %4 : vector<8x128xf32>
    %6 = arith.mulf %5, %5 : vector<8x128xf32>
    %cst = arith.constant 1.000000e+00 : f32
    %7 = vector.broadcast %cst : f32 to vector<8x128xf32>
    %8 = arith.subf %7, %6 : vector<8x128xf32>
    %cst_4 = arith.constant 0.000000e+00 : f32
    %9 = vector.broadcast %cst_4 : f32 to vector<8x128xf32>
    %10 = arith.maximumf %8, %9 : vector<8x128xf32>
    %11 = arith.mulf %10, %10 : vector<8x128xf32>
    %c0_5 = arith.constant 0 : index
    %c0_6 = arith.constant 0 : index
    %12 = vector.load %arg5[%c0_5, %c0_6] : memref<8x128xf32, #tpu.memory_space<vmem>>, vector<8x128xf32>
    %13 = arith.addf %12, %11 : vector<8x128xf32>
    %c0_7 = arith.constant 0 : index
    %c0_8 = arith.constant 0 : index
    %14 = vector.load %arg5[%c0_7, %c0_8] : memref<8x128xf32, #tpu.memory_space<vmem>>, vector<8x128xf32>
    tpu.vector_store %arg5[%c0_7, %c0_8], %13 {strides = array<i32>} : memref<8x128xf32, #tpu.memory_space<vmem>>, vector<8x128xf32>,
    %c0_i32_9 = arith.constant 0 : i32
    %15 = arith.cmpi eq, %arg1, %c0_i32_9 : i32
    %16 = arith.extui %15 : i1 to i32
    %c0_i32_10 = arith.constant 0 : i32
    %17 = arith.cmpi ne, %16, %c0_i32_10 : i32
    scf.if %17 {
      %c0_11 = arith.constant 0 : index
      %c0_12 = arith.constant 0 : index
      %18 = vector.load %arg5[%c0_11, %c0_12] : memref<8x128xf32, #tpu.memory_space<vmem>>, vector<8x128xf32>
      %19 = vector.shape_cast %18 : vector<8x128xf32> to vector<1x8x128xf32>
      %cst_13 = arith.constant dense<0.000000e+00> : vector<8x128xf32>
      %20 = vector.multi_reduction <add>, %19, %cst_13 [0] : vector<1x8x128xf32> to vector<8x128xf32>
      %c0_14 = arith.constant 0 : index
      %c0_15 = arith.constant 0 : index
      %21 = vector.load %arg4[%c0_14, %c0_15] : memref<8x128xf32, #tpu.memory_space<vmem>>, vector<8x128xf32>
      tpu.vector_store %arg4[%c0_14, %c0_15], %20 {strides = array<i32>} : memref<8x128xf32, #tpu.memory_space<vmem>>, vector<8x128xf32>,
    } else {
    }
    return
  }
  func.func @transform_0(%arg0: i32, %arg1: i32) -> (i32, i32) {
    %c1_i32 = arith.constant 1 : i32
    %0 = arith.muli %arg0, %c1_i32 : i32
    %1 = arith.addi %0, %arg1 : i32
    %c0_i32 = arith.constant 0 : i32
    %c0_i32_0 = arith.constant 0 : i32
    return %1, %c0_i32 : i32, i32
  }
  func.func @transform_1(%arg0: i32, %arg1: i32) -> (i32, i32) {
    %c1_i32 = arith.constant 1 : i32
    %0 = arith.muli %arg0, %c1_i32 : i32
    %1 = arith.addi %0, %arg1 : i32
    %c0_i32 = arith.constant 0 : i32
    %c0_i32_0 = arith.constant 0 : i32
    return %1, %c0_i32 : i32, i32
  }
  func.func @transform_2(%arg0: i32, %arg1: i32) -> (i32, i32) {
    %c0_i32 = arith.constant 0 : i32
    %c0_i32_0 = arith.constant 0 : i32
    return %arg0, %c0_i32 : i32, i32
  }
}

module attributes {stable_mosaic.version = 11 : i64} {
  func.func @_streaming_sq_kernel(%arg0: i32, %arg1: i32, %arg2: memref<8x128xf32, #tpu.memory_space<vmem>>, %arg3: memref<8x128xf32, #tpu.memory_space<vmem>>, %arg4: memref<8x128xf32, #tpu.memory_space<vmem>>, %arg5: memref<8x128xf32, #tpu.memory_space<vmem>>) attributes {dimension_semantics = [#tpu.dimension_semantics<parallel>, #tpu.dimension_semantics<arbitrary>], iteration_bounds = array<i64: 1, 1>, scalar_prefetch = 0 : i64, scratch_operands = 1 : i64, tpu.core_type = #tpu.core_type<tc>, window_params = [{transform_indices = @transform_0, window_bounds = array<i64: 8, 128>}, {transform_indices = @transform_1, window_bounds = array<i64: 8, 128>}, {transform_indices = @transform_2, window_bounds = array<i64: 8, 128>}]} {
    %c0_i32 = arith.constant 0 : i32
    %0 = arith.cmpi eq, %arg1, %c0_i32 : i32
    %1 = arith.extui %0 : i1 to i32
    %c0_i32_0 = arith.constant 0 : i32
    %2 = arith.cmpi ne, %1, %c0_i32_0 : i32
    scf.if %2 {
      %cst = arith.constant 0.000000e+00 : f32
      %13 = vector.broadcast %cst : f32 to vector<8x128xf32>
      %c0_10 = arith.constant 0 : index
      %c0_11 = arith.constant 0 : index
      %14 = vector.load %arg5[%c0_10, %c0_11] : memref<8x128xf32, #tpu.memory_space<vmem>>, vector<8x128xf32>
      tpu.vector_store %arg5[%c0_10, %c0_11], %13 {strides = array<i32>} : memref<8x128xf32, #tpu.memory_space<vmem>>, vector<8x128xf32>,
    } else {
    }
    %c0 = arith.constant 0 : index
    %c0_1 = arith.constant 0 : index
    %3 = vector.load %arg2[%c0, %c0_1] : memref<8x128xf32, #tpu.memory_space<vmem>>, vector<8x128xf32>
    %c0_2 = arith.constant 0 : index
    %c0_3 = arith.constant 0 : index
    %4 = vector.load %arg3[%c0_2, %c0_3] : memref<8x128xf32, #tpu.memory_space<vmem>>, vector<8x128xf32>
    %5 = arith.subf %3, %4 : vector<8x128xf32>
    %6 = arith.mulf %5, %5 : vector<8x128xf32>
    %c0_4 = arith.constant 0 : index
    %c0_5 = arith.constant 0 : index
    %7 = vector.load %arg5[%c0_4, %c0_5] : memref<8x128xf32, #tpu.memory_space<vmem>>, vector<8x128xf32>
    %8 = arith.addf %7, %6 : vector<8x128xf32>
    %c0_6 = arith.constant 0 : index
    %c0_7 = arith.constant 0 : index
    %9 = vector.load %arg5[%c0_6, %c0_7] : memref<8x128xf32, #tpu.memory_space<vmem>>, vector<8x128xf32>
    tpu.vector_store %arg5[%c0_6, %c0_7], %8 {strides = array<i32>} : memref<8x128xf32, #tpu.memory_space<vmem>>, vector<8x128xf32>,
    %c0_i32_8 = arith.constant 0 : i32
    %10 = arith.cmpi eq, %arg1, %c0_i32_8 : i32
    %11 = arith.extui %10 : i1 to i32
    %c0_i32_9 = arith.constant 0 : i32
    %12 = arith.cmpi ne, %11, %c0_i32_9 : i32
    scf.if %12 {
      %c0_10 = arith.constant 0 : index
      %c0_11 = arith.constant 0 : index
      %13 = vector.load %arg5[%c0_10, %c0_11] : memref<8x128xf32, #tpu.memory_space<vmem>>, vector<8x128xf32>
      %14 = vector.shape_cast %13 : vector<8x128xf32> to vector<1x8x128xf32>
      %cst = arith.constant dense<0.000000e+00> : vector<8x128xf32>
      %15 = vector.multi_reduction <add>, %14, %cst [0] : vector<1x8x128xf32> to vector<8x128xf32>
      %c0_12 = arith.constant 0 : index
      %c0_13 = arith.constant 0 : index
      %16 = vector.load %arg4[%c0_12, %c0_13] : memref<8x128xf32, #tpu.memory_space<vmem>>, vector<8x128xf32>
      tpu.vector_store %arg4[%c0_12, %c0_13], %15 {strides = array<i32>} : memref<8x128xf32, #tpu.memory_space<vmem>>, vector<8x128xf32>,
    } else {
    }
    return
  }
  func.func @transform_0(%arg0: i32, %arg1: i32) -> (i32, i32) {
    %c1_i32 = arith.constant 1 : i32
    %0 = arith.muli %arg0, %c1_i32 : i32
    %1 = arith.addi %0, %arg1 : i32
    %c0_i32 = arith.constant 0 : i32
    %c0_i32_0 = arith.constant 0 : i32
    return %1, %c0_i32 : i32, i32
  }
  func.func @transform_1(%arg0: i32, %arg1: i32) -> (i32, i32) {
    %c1_i32 = arith.constant 1 : i32
    %0 = arith.muli %arg0, %c1_i32 : i32
    %1 = arith.addi %0, %arg1 : i32
    %c0_i32 = arith.constant 0 : i32
    %c0_i32_0 = arith.constant 0 : i32
    return %1, %c0_i32 : i32, i32
  }
  func.func @transform_2(%arg0: i32, %arg1: i32) -> (i32, i32) {
    %c0_i32 = arith.constant 0 : i32
    %c0_i32_0 = arith.constant 0 : i32
    return %arg0, %c0_i32 : i32, i32
  }
}

</mosaic_0001>

<bundles_post_ra>
// kernel: contrastive_loss.3
= control target key start
LH: loop header
LB: loop body
LE: loop exit
PB: predicated region body
PF: predicated region fallthrough
CT: control target
= control target key end

     0   :  { %7 = vsyncpa [#allocation4], 0  ;;  %s105_s12 = smov [#allocation3]   ;;  %s130_s0 = inlined_call_operand.vmem [shape: f32[8,128], index: 0, kind: input, shape index: {}]   ;;  %s131_s1 = inlined_call_operand.hbm [shape: f32[8,128], index: 1, kind: input, shape index: {}]   ;;  %s132_s2 = inlined_call_operand.vmem [shape: f32[8,128], index: 2, kind: output, shape index: {}]  }
   0x1   :  { %s24_s11 = sshll.u32 %s131_s1, 4  ;;  %s26_s13 = sshll.u32 %s105_s12, 4  ;;  %s25_s11 = int_to_ptr.hbm [resolvable:$true] %s24_s11  ;;  %s27_s13 = int_to_ptr.vmem [resolvable:$true] %s26_s13 }
   0x2   :  { %29 = dma.hbm_to_vmem [thread:$0]  %s25_s11, 128, %s27_s13, [#allocation4]  }
   0x3   :  { %103 = dma.done.wait [#allocation4], 128  }
   0x4   :  { %104 = vsyncadd [#allocation4], 4294967168  ;;  %v51_v0 = vld [vmem:[%s130_s0] sm:$0xff] }
   0x5   :  { %v52_v1 = vld [vmem:[#allocation3] sm:$0xff] }
   0x6   :  { %v53_v2 = vsub.f32 %v51_v0, %v52_v1 }
   0x8   :  { %v54_v3 = vmul.f32 %v53_v2, %v53_v2 }
   0xa   :  { %v55_v4 = vsub.f32 1.0, %v54_v3 }
   0xc   :  { %v56_v5 = vmax.f32 %v55_v4, 0.0 }
   0xe   :  { %v57_v6 = vmul.f32 %v56_v5, %v56_v5 }
  0x10   :  { %66 = vst [vmem:[%s132_s2] sm:$0xff] %v57_v6 }
  0x11   :  { %71 = vsyncpa [#allocation4], 1 }

// kernel: contrastive_loss.2
= control target key start
LH: loop header
LB: loop body
LE: loop exit
PB: predicated region body
PF: predicated region fallthrough
CT: control target
= control target key end

     0   :  { %7 = vsyncpa [#allocation4], 0  ;;  %s151_s0 = inlined_call_operand.hbm [shape: f32[8,128], index: 0, kind: input, shape index: {}]   ;;  %s152_s1 = inlined_call_operand.hbm [shape: f32[8,128], index: 1, kind: input, shape index: {}]   ;;  %s153_s2 = inlined_call_operand.vmem [shape: f32[8,128], index: 2, kind: output, shape index: {}]  }
   0x1   :  { %s17_s11 = sshll.u32 %s151_s0, 4  ;;  %s18_s11 = int_to_ptr.hbm [resolvable:$true] %s17_s11 }
   0x2   :  { %8 = vsyncpa [#allocation6], 0  ;;  %s125_s12 = smov [#allocation3]   ;;  %s31_s16 = sshll.u32 %s152_s1, 4  ;;  %s32_s16 = int_to_ptr.hbm [resolvable:$true] %s31_s16 }
   0x3   :  { %s19_s13 = sshll.u32 %s125_s12, 4  ;;  %s126_s17 = smov [#allocation5]   ;;  %s20_s13 = int_to_ptr.vmem [resolvable:$true] %s19_s13 }
   0x4   :  { %22 = dma.hbm_to_vmem [thread:$0]  %s18_s11, 128, %s20_s13, [#allocation4]  }
   0x5   :  { %s33_s18 = sshll.u32 %s126_s17, 4  ;;  %s34_s18 = int_to_ptr.vmem [resolvable:$true] %s33_s18 }
   0x6   :  { %36 = dma.hbm_to_vmem [thread:$0]  %s32_s16, 128, %s34_s18, [#allocation6]  }
   0x7   :  { %121 = dma.done.wait [#allocation4], 128  }
   0x8   :  { %122 = vsyncadd [#allocation4], 4294967168 }
   0x9   :  { %123 = dma.done.wait [#allocation6], 128  }
   0xa   :  { %124 = vsyncadd [#allocation6], 4294967168  ;;  %v52_v0 = vld [vmem:[#allocation3] sm:$0xff]  ;;  %v53_v1 = vld [vmem:[#allocation5] sm:$0xff] }
   0xb   :  { %v54_v2 = vsub.f32 %v52_v0, %v53_v1 }
   0xd   :  { %v55_v3 = vmul.f32 %v54_v2, %v54_v2 }
   0xf   :  { %64 = vst [vmem:[%s153_s2] sm:$0xff] %v55_v3 }
  0x10   :  { %69 = vsyncpa [#allocation4], 1 }
  0x11   :  { %70 = vsyncpa [#allocation6], 1 }

</bundles_post_ra>
